<compile_context>
chip_gen: v6e
topology: v6e:2x2x1
jax: 0.10.0
libtpu: 0.0.40
codegen_flags: <defaults>
</compile_context>

<pallas_src>
import functools

import jax
import jax.numpy as jnp
from jax.experimental import pallas as pl
from jax.experimental.pallas import tpu as pltpu


# ------------------------------- Pallas kernel ------------------------------

def _deconv2x2_kernel(x_ref, w_ref, b_ref, o_ref, *, rows, W):
    """One M-tile of ConvTranspose2d(kernel=2, stride=2, padding=0).

    x_ref: (rows*W, Cin)         input pixels (cast to bf16 here)
    w_ref: (2, Cin, 2*Cout)      bf16, indexed [dy][ci][dx*Cout + co]
    b_ref: (1, 2*Cout)           f32 bias tiled over dx
    o_ref: (rows, 2, W, 2*Cout)  indexed [h][dy][w][dx*Cout + co]
    """
    c2 = o_ref.shape[-1]                              # 2*Cout (lane-dense)
    x = x_ref[...].astype(jnp.bfloat16)               # bf16 feeds the MXU
    bias = b_ref[...]                                 # (1, 2*Cout) f32
    for dy in range(2):                               # static unroll: 2 matmuls
        y = jnp.dot(x, w_ref[dy], preferred_element_type=jnp.float32) + bias
        o_ref[:, dy, :, :] = y.reshape(rows, W, c2).astype(o_ref.dtype)


# --------------------------------- wrapper ----------------------------------

def _pick_rows(bh, w, target_m=256):
    """Largest divisor `rows` of bh with rows*w <= target_m and rows*w % 8 == 0
    (falls back to the full extent if nothing qualifies)."""
    best = None
    for r in range(1, bh + 1):
        if bh % r == 0 and r * w <= target_m and (r * w) % 8 == 0:
            best = r
    return best if best is not None else bh


def single_deconv2d_block(params, x):
    """Forward of SingleDeconv2DBlock: ConvTranspose2d(k=2, s=2, p=0).

    x: (B, Cin, H, W) NCHW (like the torch module); returns (B, Cout, 2H, 2W).
    params: {"w": (Cin, Cout, 2, 2) torch layout, "b": (Cout,)}
    """
    w, b = params["w"], params["b"]
    B, Cin, H, W = x.shape
    Cout = w.shape[1]

    # Module boundary is NCHW; internally use channels-last so Cin/Cout map to
    # lanes and feed the MXU.  The (M, Cin) view is metadata-free after the
    # NCHW->NHWC transpose.
    x2 = jnp.transpose(x, (0, 2, 3, 1)).reshape(B * H * W, Cin)

    # (Cin, Cout, dy, dx) -> (dy, Cin, dx*Cout + co), pre-cast once to bf16.
    w2 = (jnp.transpose(w, (2, 0, 3, 1))
          .reshape(2, Cin, 2 * Cout).astype(jnp.bfloat16))
    b2 = jnp.tile(b.astype(jnp.float32), 2).reshape(1, 2 * Cout)

    rows = _pick_rows(B * H, W)          # image rows per grid step
    mt = rows * W                        # matmul M per grid step
    grid = (B * H // rows,)

    # VMEM budget from actual (double-buffered) block sizes, capped at 48 MiB.
    blk_bytes = 2 * (mt * Cin * x.dtype.itemsize        # activation tile
                     + 2 * Cin * 2 * Cout * 2           # bf16 weight slab
                     + rows * 2 * W * 2 * Cout * 4)     # output tile (f32)
    vmem_limit = int(min(48 * 2 ** 20, max(32 * 2 ** 20, 4 * blk_bytes)))

    out = pl.pallas_call(
        functools.partial(_deconv2x2_kernel, rows=rows, W=W),
        out_shape=jax.ShapeDtypeStruct((B * H, 2, W, 2 * Cout), x.dtype),
        grid_spec=pltpu.PrefetchScalarGridSpec(
            num_scalar_prefetch=0,
            grid=grid,
            in_specs=[
                pl.BlockSpec((mt, Cin), lambda i: (i, 0)),
                pl.BlockSpec((2, Cin, 2 * Cout), lambda i: (0, 0, 0)),   # resident
                pl.BlockSpec((1, 2 * Cout), lambda i: (0, 0)),
            ],
            out_specs=pl.BlockSpec((rows, 2, W, 2 * Cout),
                                   lambda i: (i, 0, 0, 0)),
        ),
        compiler_params=pltpu.CompilerParams(
            dimension_semantics=("parallel",),      # shards across TCs on v7x
            vmem_limit_bytes=vmem_limit,
        ),
    )(x2, w2, b2)

    # Fused pixel-shuffle: (B*H, 2, W, 2*Cout) is row-major identical to
    # NHWC (B, 2H, 2W, Cout) -> metadata-only reshape (no HBM traffic).
    y = out.reshape(B, 2 * H, 2 * W, Cout)
    return jnp.transpose(y, (0, 3, 1, 2))           # NHWC -> NCHW boundary


# ----------------------------------- main ------------------------------------

if __name__ == "__main__":
    B, Cin, Cout, H, W = 2, 256, 128, 16, 16

    key = jax.random.PRNGKey(0)
    kx, kw, kb = jax.random.split(key, 3)

    x = jax.random.normal(kx, (B, Cin, H, W), jnp.float32)
    scale = 1.0 / (Cin * 4) ** 0.5
    params = {
        "w": jax.random.normal(kw, (Cin, Cout, 2, 2), jnp.float32) * scale,
        "b": jax.random.normal(kb, (Cout,), jnp.float32) * 0.1,
    }

    out = jax.jit(single_deconv2d_block)(params, x)
    out = jax.block_until_ready(out)
    assert out.shape == (B, Cout, 2 * H, 2 * W), out.shape

    # Pure-JAX f32 reference of ConvTranspose2d(k=2, s=2, p=0).
    ref = jnp.einsum("bihw,ioyx->bohywx", x, params["w"])
    ref = ref.reshape(B, Cout, 2 * H, 2 * W) + params["b"][None, :, None, None]

    err = float(jnp.max(jnp.abs(out - ref)))
    assert err < 5e-2, f"max abs err {err}"          # bf16-matmul tolerance
    assert bool(jnp.all(jnp.isfinite(out)))
    print("KERNEL_OK")
</pallas_src>

<mosaic_0001>
module attributes {stable_mosaic.version = 11 : i64} {
  func.func @_deconv2x2_kernel(%arg0: i32, %arg1: memref<256x256xf32, #tpu.memory_space<vmem>>, %arg2: memref<2x256x256xbf16, #tpu.memory_space<vmem>>, %arg3: memref<1x256xf32, #tpu.memory_space<vmem>>, %arg4: memref<16x2x16x256xf32, #tpu.memory_space<vmem>>) attributes {dimension_semantics = [#tpu.dimension_semantics<parallel>], iteration_bounds = array<i64: 2>, scalar_prefetch = 0 : i64, scratch_operands = 0 : i64, tpu.core_type = #tpu.core_type<tc>, window_params = [{transform_indices = @transform_0, window_bounds = array<i64: 256, 256>}, {pipeline_mode = #tpu.pipeline_mode<synchronous>, transform_indices = @transform_1, window_bounds = array<i64: 2, 256, 256>}, {pipeline_mode = #tpu.pipeline_mode<synchronous>, transform_indices = @transform_2, window_bounds = array<i64: 1, 256>}, {transform_indices = @transform_3, window_bounds = array<i64: 16, 2, 16, 256>}]} {
    %c0 = arith.constant 0 : index
    %c0_0 = arith.constant 0 : index
    %0 = vector.load %arg1[%c0, %c0_0] : memref<256x256xf32, #tpu.memory_space<vmem>>, vector<256x256xf32>
    %1 = arith.truncf %0 : vector<256x256xf32> to vector<256x256xbf16>
    %c0_1 = arith.constant 0 : index
    %c0_2 = arith.constant 0 : index
    %2 = vector.load %arg3[%c0_1, %c0_2] : memref<1x256xf32, #tpu.memory_space<vmem>>, vector<1x256xf32>
    %c0_3 = arith.constant 0 : index
    %c0_4 = arith.constant 0 : index
    %c0_5 = arith.constant 0 : index
    %3 = vector.load %arg2[%c0_3, %c0_4, %c0_5] : memref<2x256x256xbf16, #tpu.memory_space<vmem>>, vector<1x256x256xbf16>
    %4 = vector.shape_cast %3 : vector<1x256x256xbf16> to vector<256x256xbf16>
    %cst = arith.constant dense<0.000000e+00> : vector<256x256xf32>
    %5 = tpu.matmul %1, %4, %cst {dimension_numbers = #tpu.dot_dimension_numbers<[1], [0], [0], [1], [0, 0, 1, 1], [], []>} : vector<256x256xbf16>, vector<256x256xbf16>, vector<256x256xf32> -> vector<256x256xf32>
    %6 = vector.broadcast %2 : vector<1x256xf32> to vector<256x256xf32>
    %7 = arith.addf %5, %6 : vector<256x256xf32>
    %8 = vector.shape_cast %7 : vector<256x256xf32> to vector<16x16x256xf32>
    %c0_6 = arith.constant 0 : index
    %c0_7 = arith.constant 0 : index
    %c0_8 = arith.constant 0 : index
    %c0_9 = arith.constant 0 : index
    %9 = vector.load %arg4[%c0_6, %c0_7, %c0_8, %c0_9] : memref<16x2x16x256xf32, #tpu.memory_space<vmem>>, vector<16x1x16x256xf32>
    %10 = vector.shape_cast %9 : vector<16x1x16x256xf32> to vector<16x16x256xf32>
    %11 = vector.shape_cast %8 : vector<16x16x256xf32> to vector<16x1x16x256xf32>
    tpu.vector_store %arg4[%c0_6, %c0_7, %c0_8, %c0_9], %11 {strides = array<i32>} : memref<16x2x16x256xf32, #tpu.memory_space<vmem>>, vector<16x1x16x256xf32>,
    %c1 = arith.constant 1 : index
    %c0_10 = arith.constant 0 : index
    %c0_11 = arith.constant 0 : index
    %12 = vector.load %arg2[%c1, %c0_10, %c0_11] : memref<2x256x256xbf16, #tpu.memory_space<vmem>>, vector<1x256x256xbf16>
    %13 = vector.shape_cast %12 : vector<1x256x256xbf16> to vector<256x256xbf16>
    %cst_12 = arith.constant dense<0.000000e+00> : vector<256x256xf32>
    %14 = tpu.matmul %1, %13, %cst_12 {dimension_numbers = #tpu.dot_dimension_numbers<[1], [0], [0], [1], [0, 0, 1, 1], [], []>} : vector<256x256xbf16>, vector<256x256xbf16>, vector<256x256xf32> -> vector<256x256xf32>
    %15 = vector.broadcast %2 : vector<1x256xf32> to vector<256x256xf32>
    %16 = arith.addf %14, %15 : vector<256x256xf32>
    %17 = vector.shape_cast %16 : vector<256x256xf32> to vector<16x16x256xf32>
    %c0_13 = arith.constant 0 : index
    %c1_14 = arith.constant 1 : index
    %c0_15 = arith.constant 0 : index
    %c0_16 = arith.constant 0 : index
    %18 = vector.load %arg4[%c0_13, %c1_14, %c0_15, %c0_16] : memref<16x2x16x256xf32, #tpu.memory_space<vmem>>, vector<16x1x16x256xf32>
    %19 = vector.shape_cast %18 : vector<16x1x16x256xf32> to vector<16x16x256xf32>
    %20 = vector.shape_cast %17 : vector<16x16x256xf32> to vector<16x1x16x256xf32>
    tpu.vector_store %arg4[%c0_13, %c1_14, %c0_15, %c0_16], %20 {strides = array<i32>} : memref<16x2x16x256xf32, #tpu.memory_space<vmem>>, vector<16x1x16x256xf32>,
    return
  }
  func.func @transform_0(%arg0: i32) -> (i32, i32) {
    %c0_i32 = arith.constant 0 : i32
    %c0_i32_0 = arith.constant 0 : i32
    return %arg0, %c0_i32 : i32, i32
  }
  func.func @transform_1(%arg0: i32) -> (i32, i32, i32) {
    %c0_i32 = arith.constant 0 : i32
    %c0_i32_0 = arith.constant 0 : i32
    %c0_i32_1 = arith.constant 0 : i32
    %c0_i32_2 = arith.constant 0 : i32
    return %c0_i32, %c0_i32_0, %c0_i32_1 : i32, i32, i32
  }
  func.func @transform_2(%arg0: i32) -> (i32, i32) {
    %c0_i32 = arith.constant 0 : i32
    %c0_i32_0 = arith.constant 0 : i32
    %c0_i32_1 = arith.constant 0 : i32
    return %c0_i32, %c0_i32_0 : i32, i32
  }
  func.func @transform_3(%arg0: i32) -> (i32, i32, i32, i32) {
    %c0_i32 = arith.constant 0 : i32
    %c0_i32_0 = arith.constant 0 : i32
    %c0_i32_1 = arith.constant 0 : i32
    %c0_i32_2 = arith.constant 0 : i32
    return %arg0, %c0_i32, %c0_i32_0, %c0_i32_1 : i32, i32, i32, i32
  }
}

</mosaic_0001>

<bundles_post_ra>
// kernel: tile.8
= control target key start
LH: loop header
LB: loop body
LE: loop exit
PB: predicated region body
PF: predicated region fallthrough
CT: control target
= control target key end

     0   :  { %s22_s0 = inlined_call_operand.vmem [shape: f32[128], index: 0, kind: input, shape index: {}]   ;;  %s23_s1 = inlined_call_operand.vmem [shape: f32[2,128], index: 1, kind: output, shape index: {}]  }
   0x1   :  { %v4_v0 = vld [vmem:[%s22_s0] ss:$0 sm:$0xff] }
   0x2   :  { %5 = vst [vmem:[%s23_s1] sm:$0x3] %v4_v0 }

// kernel: single_deconv2d_block.1
= control target key start
LH: loop header
LB: loop body
LE: loop exit
PB: predicated region body
PF: predicated region fallthrough
CT: control target
= control target key end

     0   :  { %s1552_s12 = smov 0   ;;  %s2096_s0 = inlined_call_operand.vmem [shape: f32[512,256], index: 0, kind: input, shape index: {}]   ;;  %s2097_s1 = inlined_call_operand.vmem [shape: bf16[2,256,256], index: 1, kind: input, shape index: {}]   ;;  %s2098_s2 = inlined_call_operand.vmem [shape: f32[1,256], index: 2, kind: input, shape index: {}]   ;;  %s2099_s3 = inlined_call_operand.vmem [shape: f32[32,2,16,256], index: 3, kind: output, shape index: {}]  }
   0x1 LB: > { %s1245_s13 = sadd.s32 4294967295, %s1530_s12   ;;  %p1249_p0 = scmp.ge.s32.totalorder %s1530_s12, 1  ;;  %s1530_s12 = sphi %s1552_s12, %s13_s12  }
   0x2   : > { %p139_p1 = scmp.lt.s32.totalorder %s1530_s12, 3 }
   0x4   : > { %p140_p2 = pnand %p1249_p0, %p139_p1 }
   0x5   : > { %s1250_s24 = sshll.u32 (!%p140_p2), %s1245_s13, 5  ;;  %s1253_s23 = sshll.u32 (!%p140_p2), %s1245_s13, 4 }
   0x6   : > { %143 = sbr.rel (%p140_p2) target bundleno = 399 (0x18f), region = 32  ;;  %p166_p3 = scmp.lt.s32.totalorder (!%p140_p2), %s1250_s24, 63 }
   0x7   : > { %p173_p4 = scmp.lt.s32.totalorder (!%p140_p2), %s1253_s23, 31 }
   0xb   : > { %v1428_v0 = vld [vmem:[%s2097_s1 + $0x74] ss:$8 sps:$4 sm:$0xff]   ;;  %v1432_v2 = vld [vmem:[%s2097_s1 + $0x70] ss:$8 sps:$4 sm:$0xff]   ;;  %v1434_v4 = vld [vmem:[%s2097_s1 + $0x64] ss:$8 sps:$4 sm:$0xff]  }
   0xc   : > { %v1430_v1 = vld [vmem:[%s2097_s1 + $0x174] ss:$8 sps:$4 sm:$0xff]   ;;  %479 = vmatprep.subr.bf16.mxu0 %v1428_v0  ;;  %v1433_v3 = vld [vmem:[%s2097_s1 + $0x170] ss:$8 sps:$4 sm:$0xff]   ;;  %v1436_v5 = vld [vmem:[%s2097_s1 + $0x164] ss:$8 sps:$4 sm:$0xff]  }
   0xd   : > { %929 = vmatprep.subr.bf16.mxu1 %v1430_v1  ;;  %480 = vmatpush1.bf16.msra.mxu0 %v1432_v2  ;;  %v1438_v6 = vld [vmem:[%s2097_s1 + $0x60] ss:$8 sps:$4 sm:$0xff]   ;;  %v1440_v8 = vld [vmem:[%s2097_s1 + $0x54] ss:$8 sps:$4 sm:$0xff]   ;;  %v1444_v10 = vld [vmem:[%s2097_s1 + $0x50] ss:$8 sps:$4 sm:$0xff]  }
   0xe   : > { %930 = vmatpush1.bf16.msra.mxu1 %v1433_v3  ;;  %481 = vmatprep.subr.bf16.mxu0 %v1434_v4  ;;  %v1439_v7 = vld [vmem:[%s2097_s1 + $0x160] ss:$8 sps:$4 sm:$0xff]   ;;  %v1442_v9 = vld [vmem:[%s2097_s1 + $0x154] ss:$8 sps:$4 sm:$0xff]   ;;  %v1445_v11 = vld [vmem:[%s2097_s1 + $0x150] ss:$8 sps:$4 sm:$0xff]  }
   0xf   : > { %931 = vmatprep.subr.bf16.mxu1 %v1436_v5  ;;  %v1446_v12 = vld [vmem:[%s2097_s1 + $0x44] ss:$8 sps:$4 sm:$0xff]   ;;  %v1450_v14 = vld [vmem:[%s2097_s1 + $0x40] ss:$8 sps:$4 sm:$0xff]   ;;  %v1452_v16 = vld [vmem:[%s2097_s1 + $0x34] ss:$8 sps:$4 sm:$0xff]  }
  0x10   : > { %v1448_v13 = vld [vmem:[%s2097_s1 + $0x144] ss:$8 sps:$4 sm:$0xff]   ;;  %v1451_v15 = vld [vmem:[%s2097_s1 + $0x140] ss:$8 sps:$4 sm:$0xff]   ;;  %v1454_v17 = vld [vmem:[%s2097_s1 + $0x134] ss:$8 sps:$4 sm:$0xff]  }
  0x11   : > { %482 = vmatpush1.bf16.msra.mxu0 %v1438_v6  ;;  %v1456_v18 = vld [vmem:[%s2097_s1 + $0x30] ss:$8 sps:$4 sm:$0xff]   ;;  %v1458_v20 = vld [vmem:[%s2097_s1 + $0x24] ss:$8 sps:$4 sm:$0xff]   ;;  %v1462_v22 = vld [vmem:[%s2097_s1 + $0x20] ss:$8 sps:$4 sm:$0xff]  }
  0x12   : > { %932 = vmatpush1.bf16.msra.mxu1 %v1439_v7  ;;  %483 = vmatprep.subr.bf16.mxu0 %v1440_v8  ;;  %v1457_v19 = vld [vmem:[%s2097_s1 + $0x130] ss:$8 sps:$4 sm:$0xff]   ;;  %v1460_v21 = vld [vmem:[%s2097_s1 + $0x124] ss:$8 sps:$4 sm:$0xff]   ;;  %v1463_v23 = vld [vmem:[%s2097_s1 + $0x120] ss:$8 sps:$4 sm:$0xff]  }
  0x13   : > { %933 = vmatprep.subr.bf16.mxu1 %v1442_v9  ;;  %v1464_v24 = vld [vmem:[%s2097_s1 + $0x14] ss:$8 sps:$4 sm:$0xff]   ;;  %v1468_v26 = vld [vmem:[%s2097_s1 + $0x10] ss:$8 sps:$4 sm:$0xff]   ;;  %v1470_v28 = vld [vmem:[%s2097_s1 + $0x4] ss:$8 sps:$4 sm:$0xff]  }
  0x14   : > { %v1466_v25 = vld [vmem:[%s2097_s1 + $0x114] ss:$8 sps:$4 sm:$0xff]   ;;  %v1469_v27 = vld [vmem:[%s2097_s1 + $0x110] ss:$8 sps:$4 sm:$0xff]   ;;  %v1472_v29 = vld [vmem:[%s2097_s1 + $0x104] ss:$8 sps:$4 sm:$0xff]  }
  0x15   : > { %484 = vmatpush1.bf16.msra.mxu0 %v1444_v10  ;;  %v1474_v30 = vld [vmem:[%s2097_s1] ss:$8 sps:$4 sm:$0xff]   ;;  %v1476_v32 = vld [vmem:[%s2097_s1 + $0xf4] ss:$8 sps:$4 sm:$0xff]   ;;  %v1480_v34 = vld [vmem:[%s2097_s1 + $0xf0] ss:$8 sps:$4 sm:$0xff]  }
  0x16   : > { %934 = vmatpush1.bf16.msra.mxu1 %v1445_v11  ;;  %485 = vmatprep.subr.bf16.mxu0 %v1446_v12  ;;  %v1475_v31 = vld [vmem:[%s2097_s1 + $0x100] ss:$8 sps:$4 sm:$0xff]   ;;  %v1478_v33 = vld [vmem:[%s2097_s1 + $0x1f4] ss:$8 sps:$4 sm:$0xff]   ;;  %v1481_v35 = vld [vmem:[%s2097_s1 + $0x1f0] ss:$8 sps:$4 sm:$0xff]  }
  0x17   : > { %935 = vmatprep.subr.bf16.mxu1 %v1448_v13  ;;  %v1482_v36 = vld [vmem:[%s2097_s1 + $0xe4] ss:$8 sps:$4 sm:$0xff]   ;;  %s2101_s24 = smov (!%p166_p3, %s1250_s24), 63  ;;  %v1486_v38 = vld [vmem:[%s2097_s1 + $0xe0] ss:$8 sps:$4 sm:$0xff]   ;;  %s2103_s23 = smov (!%p173_p4, %s1253_s23), 31 }
  0x18   : > { %v1484_v37 = vld [vmem:[%s2097_s1 + $0x1e4] ss:$8 sps:$4 sm:$0xff]   ;;  %v1487_v39 = vld [vmem:[%s2097_s1 + $0x1e0] ss:$8 sps:$4 sm:$0xff]   ;;  %v1488_v40 = vld [vmem:[%s2097_s1 + $0xd4] ss:$8 sps:$4 sm:$0xff]  }
  0x19   : > { %486 = vmatpush1.bf16.msra.mxu0 %v1450_v14  ;;  %s1418_s22 = sshll.u32 %s2101_s24, 4  ;;  %v1490_v41 = vld [vmem:[%s2097_s1 + $0x1d4] ss:$8 sps:$4 sm:$0xff]   ;;  %v1492_v42 = vld [vmem:[%s2097_s1 + $0xd0] ss:$8 sps:$4 sm:$0xff]   ;;  %s1419_s27 = sshll.u32 %s2103_s23, 6 }
  0x1a   : > { %936 = vmatpush1.bf16.msra.mxu1 %v1451_v15  ;;  %487 = vmatprep.subr.bf16.mxu0 %v1452_v16  ;;  %v1493_v43 = vld [vmem:[%s2097_s1 + $0x1d0] ss:$8 sps:$4 sm:$0xff]   ;;  %s1697_s5 = scalar_lea.vmem %s2096_s0, %s1418_s22  ;;  %v1494_v44 = vld [vmem:[%s2097_s1 + $0xc4] ss:$8 sps:$4 sm:$0xff]   ;;  %v1498_v48 = vld [vmem:[%s2097_s1 + $0xc0] ss:$8 sps:$4 sm:$0xff]   ;;  %s1835_s29 = scalar_lea.vmem %s2099_s3, %s1419_s27 }
  0x1b   : > { %937 = vmatprep.subr.bf16.mxu1 %v1454_v17  ;;  %v1496_v45 = vld [vmem:[%s2097_s1 + $0x1c4] ss:$8 sps:$4 sm:$0xff]   ;;  %v182_v47 = vld [vmem:[%s1697_s5 + $0x18] sm:$0xff]  ;;  %v1499_v49 = vld [vmem:[%s2097_s1 + $0x1c0] ss:$8 sps:$4 sm:$0xff]  }
  0x1c   : > { %v180_v46 = vld [vmem:[%s1697_s5 + $0x8] sm:$0xff]  ;;  %v1500_v51 = vld [vmem:[%s2097_s1 + $0xb4] ss:$8 sps:$4 sm:$0xff]   ;;  %v1504_v53 = vld [vmem:[%s2097_s1 + $0xb0] ss:$8 sps:$4 sm:$0xff]  }
  0x1d   : > { %488 = vmatpush1.bf16.msra.mxu0 %v1456_v18  ;;  %v244_v50 = vpack.c.bf16 %v182_v47, %v180_v46  ;;  %v1502_v52 = vld [vmem:[%s2097_s1 + $0x1b4] ss:$8 sps:$4 sm:$0xff]   ;;  %v1505_v54 = vld [vmem:[%s2097_s1 + $0x1b0] ss:$8 sps:$4 sm:$0xff]   ;;  %v1506_v55 = vld [vmem:[%s2097_s1 + $0xa4] ss:$8 sps:$4 sm:$0xff]  }
  0x1e   : > { %938 = vmatpush1.bf16.msra.mxu1 %v1457_v19  ;;  %489 = vmatprep.subr.bf16.mxu0 %v1458_v20  ;;  %v1508_v56 = vld [vmem:[%s2097_s1 + $0x1a4] ss:$8 sps:$4 sm:$0xff]   ;;  %v1510_v57 = vld [vmem:[%s2097_s1 + $0xa0] ss:$8 sps:$4 sm:$0xff]   ;;  %v1512_v59 = vld [vmem:[%s2097_s1 + $0x94] ss:$8 sps:$4 sm:$0xff]  }
  0x1f   : > { %939 = vmatprep.subr.bf16.mxu1 %v1460_v21  ;;  %511 = vmatprep.mubr.bf16.mxu0 %v244_v50  ;;  %v1511_v58 = vld [vmem:[%s2097_s1 + $0x1a0] ss:$8 sps:$4 sm:$0xff]   ;;  %v1514_v60 = vld [vmem:[%s2097_s1 + $0x194] ss:$8 sps:$4 sm:$0xff]   ;;  %v1516_v61 = vld [vmem:[%s2097_s1 + $0x90] ss:$8 sps:$4 sm:$0xff]  }
  0x20   : > { %961 = vmatprep.mubr.bf16.mxu1 %v244_v50  ;;  %v1517_v62 = vld [vmem:[%s2097_s1 + $0x190] ss:$8 sps:$4 sm:$0xff]   ;;  %v1518_v63 = vld [vmem:[%s2097_s1 + $0x84] ss:$8 sps:$4 sm:$0xff]   ;;  %v1522_v1 = vld [vmem:[%s2097_s1 + $0x80] ss:$8 sps:$4 sm:$0xff]  }
  0x21   : > { %490 = vmatpush1.bf16.msra.mxu0 %v1462_v22  ;;  %v1520_v0 = vld [vmem:[%s2097_s1 + $0x184] ss:$8 sps:$4 sm:$0xff]   ;;  %v1523_v2 = vld [vmem:[%s2097_s1 + $0x180] ss:$8 sps:$4 sm:$0xff]   ;;  %v181_v4 = vld [vmem:[%s1697_s5 + $0x10] sm:$0xff] }
  0x22   : > { %940 = vmatpush1.bf16.msra.mxu1 %v1463_v23  ;;  %491 = vmatprep.subr.bf16.mxu0 %v1464_v24  ;;  %v179_v3 = vld [vmem:[%s1697_s5] sm:$0xff]  ;;  %v184_v5 = vld [vmem:[%s1697_s5 + $0x28] sm:$0xff]  ;;  %v186_v6 = vld [vmem:[%s1697_s5 + $0x38] sm:$0xff] }
  0x23   : > { %941 = vmatprep.subr.bf16.mxu1 %v1466_v25  ;;  %v243_v7 = vpack.c.bf16 %v181_v4, %v179_v3  ;;  %v246_v8 = vpack.c.bf16 %v186_v6, %v184_v5  ;;  %v183_v9 = vld [vmem:[%s1697_s5 + $0x20] sm:$0xff]  ;;  %v185_v10 = vld [vmem:[%s1697_s5 + $0x30] sm:$0xff]  ;;  %v188_v11 = vld [vmem:[%s1697_s5 + $0x48] sm:$0xff] }
  0x24   : > { %v190_v12 = vld [vmem:[%s1697_s5 + $0x58] sm:$0xff]  ;;  %v245_v13 = vpack.c.bf16 %v185_v10, %v183_v9  ;;  %v187_v15 = vld [vmem:[%s1697_s5 + $0x40] sm:$0xff]  ;;  %v189_v16 = vld [vmem:[%s1697_s5 + $0x50] sm:$0xff] }
  0x25   : > { %492 = vmatpush1.bf16.msra.mxu0 %v1468_v26  ;;  %v248_v14 = vpack.c.bf16 %v190_v12, %v188_v11  ;;  %v192_v17 = vld [vmem:[%s1697_s5 + $0x68] sm:$0xff]  ;;  %v194_v18 = vld [vmem:[%s1697_s5 + $0x78] sm:$0xff]  ;;  %v247_v19 = vpack.c.bf16 %v189_v16, %v187_v15  ;;  %v191_v21 = vld [vmem:[%s1697_s5 + $0x60] sm:$0xff] }
  0x26   : > { %942 = vmatpush1.bf16.msra.mxu1 %v1469_v27  ;;  %493 = vmatprep.subr.bf16.mxu0 %v1470_v28  ;;  %v250_v20 = vpack.c.bf16 %v194_v18, %v192_v17  ;;  %v193_v22 = vld [vmem:[%s1697_s5 + $0x70] sm:$0xff]  ;;  %v196_v23 = vld [vmem:[%s1697_s5 + $0x88] sm:$0xff]  ;;  %v198_v24 = vld [vmem:[%s1697_s5 + $0x98] sm:$0xff] }
  0x27   : > { %943 = vmatprep.subr.bf16.mxu1 %v1472_v29  ;;  %v249_v25 = vpack.c.bf16 %v193_v22, %v191_v21  ;;  %v252_v26 = vpack.c.bf16 %v198_v24, %v196_v23  ;;  %v195_v27 = vld [vmem:[%s1697_s5 + $0x80] sm:$0xff]  ;;  %v197_v28 = vld [vmem:[%s1697_s5 + $0x90] sm:$0xff]  ;;  %v200_v29 = vld [vmem:[%s1697_s5 + $0xa8] sm:$0xff] }
  0x28   : > { %v209_v46 = vld [vmem:[%s1697_s5 + $0xf0] sm:$0xff]  ;;  %v212_v47 = vld [vmem:[%s1697_s5 + $0x108] sm:$0xff]  ;;  %v223_v5 = vld [vmem:[%s1697_s5 + $0x160] sm:$0xff] }
  0x29   : > { %494 = vmatpush1.bf16.msra.mxu0 %v1474_v30  ;;  %v202_v30 = vld [vmem:[%s1697_s5 + $0xb8] sm:$0xff]  ;;  %v225_v6 = vld [vmem:[%s1697_s5 + $0x170] sm:$0xff]  ;;  %v227_v11 = vld [vmem:[%s1697_s5 + $0x180] sm:$0xff] }
  0x2a   : > { %944 = vmatpush1.bf16.msra.mxu1 %v1475_v31  ;;  %495 = vmatprep.subr.bf16.mxu0 %v1476_v32  ;;  %v251_v31 = vpack.c.bf16 %v197_v28, %v195_v27  ;;  %v254_v32 = vpack.c.bf16 %v202_v30, %v200_v29  ;;  %v265_v9 = vpack.c.bf16 %v225_v6, %v223_v5  ;;  %v229_v12 = vld [vmem:[%s1697_s5 + $0x190] sm:$0xff]  ;;  %v231_v17 = vld [vmem:[%s1697_s5 + $0x1a0] sm:$0xff] }
  0x2b   : > { %945 = vmatprep.subr.bf16.mxu1 %v1478_v33  ;;  %v199_v33 = vld [vmem:[%s1697_s5 + $0xa0] sm:$0xff]  ;;  %v267_v15 = vpack.c.bf16 %v229_v12, %v227_v11  ;;  %v233_v18 = vld [vmem:[%s1697_s5 + $0x1b0] sm:$0xff] }
  0x2c   : > { %v269_v21 = vpack.c.bf16 %v233_v18, %v231_v17  ;;  %v235_v23 = vld [vmem:[%s1697_s5 + $0x1c0] sm:$0xff]  ;;  %v237_v24 = vld [vmem:[%s1697_s5 + $0x1d0] sm:$0xff] }
  0x2d   : > { %496 = vmatpush2.bf16.msra.mxu0 %v1480_v34  ;;  %v201_v34 = vld [vmem:[%s1697_s5 + $0xb0] sm:$0xff]  ;;  %v271_v27 = vpack.c.bf16 %v237_v24, %v235_v23  ;;  %v239_v29 = vld [vmem:[%s1697_s5 + $0x1e0] sm:$0xff] }
  0x2e   : > { %946 = vmatpush2.bf16.msra.mxu1 %v1481_v35  ;;  %497 = vmatprep.subr.bf16.mxu0 %v1482_v36  ;;  %v204_v35 = vld [vmem:[%s1697_s5 + $0xc8] sm:$0xff]  ;;  %v206_v36 = vld [vmem:[%s1697_s5 + $0xd8] sm:$0xff]  ;;  %v241_v30 = vld [vmem:[%s1697_s5 + $0x1f0] sm:$0xff] }
  0x2f   : > { %947 = vmatprep.subr.bf16.mxu1 %v1484_v37  ;;  %v253_v37 = vpack.c.bf16 %v201_v34, %v199_v33 }
  0x31   : > { %498 = vmatpush2.bf16.msra.mxu0 %v1486_v38  ;;  %v256_v38 = vpack.c.bf16 %v206_v36, %v204_v35  ;;  %v275_v35 = vld [vmem:[%s2098_s2] sm:$0x3] }
  0x32   : > { %948 = vmatpush2.bf16.msra.mxu1 %v1487_v39  ;;  %499 = vmatprep.subr.bf16.mxu0 %v1488_v40  ;;  %v203_v39 = vld [vmem:[%s1697_s5 + $0xc0] sm:$0xff]  ;;  %v205_v40 = vld [vmem:[%s1697_s5 + $0xd0] sm:$0xff] }
  0x33   : > { %949 = vmatprep.subr.bf16.mxu1 %v1490_v41  ;;  %v208_v41 = vld [vmem:[%s1697_s5 + $0xe8] sm:$0xff] }
  0x35   : > { %500 = vmatpush2.bf16.msra.mxu0 %v1492_v42  ;;  %v210_v42 = vld [vmem:[%s1697_s5 + $0xf8] sm:$0xff] }
  0x36   : > { %950 = vmatpush2.bf16.msra.mxu1 %v1493_v43  ;;  %501 = vmatprep.subr.bf16.mxu0 %v1494_v44  ;;  %v255_v43 = vpack.c.bf16 %v205_v40, %v203_v39  ;;  %v258_v44 = vpack.c.bf16 %v210_v42, %v208_v41 }
  0x37   : > { %951 = vmatprep.subr.bf16.mxu1 %v1496_v45  ;;  %v207_v45 = vld [vmem:[%s1697_s5 + $0xe0] sm:$0xff] }
  0x39   : > { %502 = vmatpush2.bf16.msra.mxu0 %v1498_v48  ;;  %v214_v48 = vld [vmem:[%s1697_s5 + $0x118] sm:$0xff] }
  0x3a   : > { %952 = vmatpush2.bf16.msra.mxu1 %v1499_v49  ;;  %503 = vmatprep.subr.bf16.mxu0 %v1500_v51  ;;  %v257_v49 = vpack.c.bf16 %v209_v46, %v207_v45  ;;  %v260_v50 = vpack.c.bf16 %v214_v48, %v212_v47  ;;  %v211_v51 = vld [vmem:[%s1697_s5 + $0x100] sm:$0xff] }
  0x3b   : > { %953 = vmatprep.subr.bf16.mxu1 %v1502_v52  ;;  %v213_v52 = vld [vmem:[%s1697_s5 + $0x110] sm:$0xff] }
  0x3d   : > { %504 = vmatpush2.bf16.msra.mxu0 %v1504_v53  ;;  %v216_v53 = vld [vmem:[%s1697_s5 + $0x128] sm:$0xff] }
  0x3e   : > { %954 = vmatpush2.bf16.msra.mxu1 %v1505_v54  ;;  %505 = vmatprep.subr.bf16.mxu0 %v1506_v55  ;;  %v218_v54 = vld [vmem:[%s1697_s5 + $0x138] sm:$0xff]  ;;  %v259_v55 = vpack.c.bf16 %v213_v52, %v211_v51 }
  0x3f   : > { %955 = vmatprep.subr.bf16.mxu1 %v1508_v56  ;;  %v262_v56 = vpack.c.bf16 %v218_v54, %v216_v53 }
  0x41   : > { %506 = vmatpush2.bf16.msra.mxu0 %v1510_v57  ;;  %v215_v57 = vld [vmem:[%s1697_s5 + $0x120] sm:$0xff] }
  0x42   : > { %956 = vmatpush2.bf16.msra.mxu1 %v1511_v58  ;;  %507 = vmatprep.subr.bf16.mxu0 %v1512_v59  ;;  %v217_v58 = vld [vmem:[%s1697_s5 + $0x130] sm:$0xff]  ;;  %v220_v59 = vld [vmem:[%s1697_s5 + $0x148] sm:$0xff] }
  0x43   : > { %957 = vmatprep.subr.bf16.mxu1 %v1514_v60  ;;  %v222_v60 = vld [vmem:[%s1697_s5 + $0x158] sm:$0xff] }
  0x45   : > { %508 = vmatpush2.bf16.msra.mxu0 %v1516_v61  ;;  %v261_v61 = vpack.c.bf16 %v217_v58, %v215_v57 }
  0x46   : > { %958 = vmatpush2.bf16.msra.mxu1 %v1517_v62  ;;  %509 = vmatprep.subr.bf16.mxu0 %v1518_v63  ;;  %v264_v62 = vpack.c.bf16 %v222_v60, %v220_v59  ;;  %v219_v63 = vld [vmem:[%s1697_s5 + $0x140] sm:$0xff] }
  0x47   : > { %959 = vmatprep.subr.bf16.mxu1 %v1520_v0  ;;  %v221_v0 = vld [vmem:[%s1697_s5 + $0x150] sm:$0xff] }
  0x48   : > { %v263_v3 = vpack.c.bf16 %v221_v0, %v219_v63 }
  0x49   : > { %510 = vmatpush2.bf16.msra.mxu0 %v1522_v1  ;;  %v224_v1 = vld [vmem:[%s1697_s5 + $0x168] sm:$0xff] }
  0x4a   : > { %960 = vmatpush2.bf16.msra.mxu1 %v1523_v2  ;;  %v226_v2 = vld [vmem:[%s1697_s5 + $0x178] sm:$0xff] }
  0x4b   : > { %v266_v4 = vpack.c.bf16 %v226_v2, %v224_v1 }
  0x4c   : > { %512 = vmatmul.mubr.bf16.vlgmr.msra.gmra.mxu0 %v243_v7 }
  0x4d   : > { %962 = vmatmul.mubr.bf16.vlgmr.msra.gmra.mxu1 %v243_v7  ;;  %521 = vmatprep.mubr.bf16.mxu0 %v246_v8  ;;  %v228_v7 = vld [vmem:[%s1697_s5 + $0x188] sm:$0xff] }
  0x4e   : > { %971 = vmatprep.mubr.bf16.mxu1 %v246_v8  ;;  %v230_v8 = vld [vmem:[%s1697_s5 + $0x198] sm:$0xff] }
  0x4f   : > { %v268_v10 = vpack.c.bf16 %v230_v8, %v228_v7 }
  0x54   : > { %522 = vmatmul.mubr.bf16.gmra.mxu0 %v245_v13 }
  0x55   : > { %972 = vmatmul.mubr.bf16.gmra.mxu1 %v245_v13  ;;  %531 = vmatprep.mubr.bf16.mxu0 %v248_v14  ;;  %v232_v13 = vld [vmem:[%s1697_s5 + $0x1a8] sm:$0xff] }
  0x56   : > { %981 = vmatprep.mubr.bf16.mxu1 %v248_v14  ;;  %v234_v14 = vld [vmem:[%s1697_s5 + $0x1b8] sm:$0xff] }
  0x57   : > { %v270_v16 = vpack.c.bf16 %v234_v14, %v232_v13 }
  0x5c   : > { %532 = vmatmul.mubr.bf16.gmra.mxu0 %v247_v19 }
  0x5d   : > { %982 = vmatmul.mubr.bf16.gmra.mxu1 %v247_v19  ;;  %541 = vmatprep.mubr.bf16.mxu0 %v250_v20  ;;  %v236_v19 = vld [vmem:[%s1697_s5 + $0x1c8] sm:$0xff] }
  0x5e   : > { %991 = vmatprep.mubr.bf16.mxu1 %v250_v20  ;;  %v238_v20 = vld [vmem:[%s1697_s5 + $0x1d8] sm:$0xff] }
  0x5f   : > { %v272_v22 = vpack.c.bf16 %v238_v20, %v236_v19 }
  0x64   : > { %542 = vmatmul.mubr.bf16.gmra.mxu0 %v249_v25 }
  0x65   : > { %992 = vmatmul.mubr.bf16.gmra.mxu1 %v249_v25  ;;  %551 = vmatprep.mubr.bf16.mxu0 %v252_v26  ;;  %v240_v25 = vld [vmem:[%s1697_s5 + $0x1e8] sm:$0xff] }
  0x66   : > { %1001 = vmatprep.mubr.bf16.mxu1 %v252_v26  ;;  %v242_v26 = vld [vmem:[%s1697_s5 + $0x1f8] sm:$0xff] }
  0x67   : > { %v274_v28 = vpack.c.bf16 %v242_v26, %v240_v25 }
  0x6c   : > { %552 = vmatmul.mubr.bf16.gmra.mxu0 %v251_v31 }
  0x6d   : > { %1002 = vmatmul.mubr.bf16.gmra.mxu1 %v251_v31  ;;  %561 = vmatprep.mubr.bf16.mxu0 %v254_v32  ;;  %v273_v31 = vpack.c.bf16 %v241_v30, %v239_v29 }
  0x6e   : > { %1011 = vmatprep.mubr.bf16.mxu1 %v254_v32  ;;  %v309_v32 = vlaneseq }
  0x70   : > { %v310_v33 = vshrl.u32 %v309_v32, 7 }
  0x72   : > { %v311_v34 = vsub.s32 0, %v310_v33  ;;  %v315_v36 = vsub.s32 1, %v310_v33 }
  0x74   : > { %562 = vmatmul.mubr.bf16.gmra.mxu0 %v253_v37 }
  0x75   : > { %1012 = vmatmul.mubr.bf16.gmra.mxu1 %v253_v37  ;;  %571 = vmatprep.mubr.bf16.mxu0 %v256_v38  ;;  %v1828_v37 = vrot.slane %v275_v35, %v311_v34 }
  0x76   : > { %1021 = vmatprep.mubr.bf16.mxu1 %v256_v38  ;;  %v1830_v38 = vrot.slane %v275_v35, %v315_v36 }
  0x7c   : > { %572 = vmatmul.mubr.bf16.gmra.mxu0 %v255_v43 }
  0x7d   : > { %1022 = vmatmul.mubr.bf16.gmra.mxu1 %v255_v43  ;;  %581 = vmatprep.mubr.bf16.mxu0 %v258_v44 }
  0x7e   : > { %1031 = vmatprep.mubr.bf16.mxu1 %v258_v44 }
  0x84   : > { %582 = vmatmul.mubr.bf16.gmra.mxu0 %v257_v49 }
  0x85   : > { %1032 = vmatmul.mubr.bf16.gmra.mxu1 %v257_v49  ;;  %591 = vmatprep.mubr.bf16.mxu0 %v260_v50 }
  0x86   : > { %1041 = vmatprep.mubr.bf16.mxu1 %v260_v50 }
  0x8c   : > { %592 = vmatmul.mubr.bf16.gmra.mxu0 %v259_v55 }
  0x8d   : > { %1042 = vmatmul.mubr.bf16.gmra.mxu1 %v259_v55  ;;  %601 = vmatprep.mubr.bf16.mxu0 %v262_v56 }
  0x8e   : > { %1051 = vmatprep.mubr.bf16.mxu1 %v262_v56 }
  0x94   : > { %602 = vmatmul.mubr.bf16.gmra.mxu0 %v261_v61 }
  0x95   : > { %1052 = vmatmul.mubr.bf16.gmra.mxu1 %v261_v61  ;;  %611 = vmatprep.mubr.bf16.mxu0 %v264_v62 }
  0x96   : > { %1061 = vmatprep.mubr.bf16.mxu1 %v264_v62 }
  0x9c   : > { %612 = vmatmul.mubr.bf16.gmra.mxu0 %v263_v3 }
  0x9d   : > { %1062 = vmatmul.mubr.bf16.gmra.mxu1 %v263_v3  ;;  %621 = vmatprep.mubr.bf16.mxu0 %v266_v4 }
  0x9e   : > { %1071 = vmatprep.mubr.bf16.mxu1 %v266_v4 }
  0xa4   : > { %622 = vmatmul.mubr.bf16.gmra.mxu0 %v265_v9 }
  0xa5   : > { %1072 = vmatmul.mubr.bf16.gmra.mxu1 %v265_v9  ;;  %631 = vmatprep.mubr.bf16.mxu0 %v268_v10 }
  0xa6   : > { %1081 = vmatprep.mubr.bf16.mxu1 %v268_v10 }
  0xac   : > { %632 = vmatmul.mubr.bf16.gmra.mxu0 %v267_v15 }
  0xad   : > { %1082 = vmatmul.mubr.bf16.gmra.mxu1 %v267_v15  ;;  %641 = vmatprep.mubr.bf16.mxu0 %v270_v16 }
  0xae   : > { %1091 = vmatprep.mubr.bf16.mxu1 %v270_v16 }
  0xb4   : > { %642 = vmatmul.mubr.bf16.gmra.mxu0 %v269_v21 }
  0xb5   : > { %1092 = vmatmul.mubr.bf16.gmra.mxu1 %v269_v21  ;;  %651 = vmatprep.mubr.bf16.mxu0 %v272_v22 }
  0xb6   : > { %1101 = vmatprep.mubr.bf16.mxu1 %v272_v22 }
  0xbc   : > { %652 = vmatmul.mubr.bf16.gmra.mxu0 %v271_v27 }
  0xbd   : > { %1102 = vmatmul.mubr.bf16.gmra.mxu1 %v271_v27  ;;  %661 = vmatprep.mubr.bf16.mxu0 %v274_v28 }
  0xbe   : > { %1111 = vmatprep.mubr.bf16.mxu1 %v274_v28 }
  0xc4   : > { %662 = vmatmul.mubr.bf16.gmra.mxu0 %v273_v31 }
  0xc5   : > { %1112 = vmatmul.mubr.bf16.gmra.mxu1 %v273_v31 }
 0x10c   : > { %v513_v39 = vpop.f32.mrf.mxu0 }
 0x10d   : > { %v963_v40 = vpop.f32.mrf.mxu1  ;;  %v514_v41 = vadd.f32 %v513_v39, %v1828_v37 }
 0x10e   : > { %v964_v42 = vadd.f32 %v963_v40, %v1828_v37  ;;  %v515_v43 = vpop.f32.mrf.mxu0 }
 0x10f   : > { %v965_v44 = vpop.f32.mrf.mxu1  ;;  %672 = vst [vmem:[%s1835_s29] sm:$0xff] %v514_v41  ;;  %v516_v45 = vadd.f32 %v515_v43, %v1830_v38 }
 0x110   : > { %1352 = vst [vmem:[%s1835_s29 + $0x20] sm:$0xff] %v964_v42  ;;  %v966_v46 = vadd.f32 %v965_v44, %v1830_v38  ;;  %v517_v47 = vpop.f32.mrf.mxu0 }
 0x111   : > { %v967_v48 = vpop.f32.mrf.mxu1  ;;  %673 = vst [vmem:[%s1835_s29 + $0x8] sm:$0xff] %v516_v45  ;;  %v518_v49 = vadd.f32 %v517_v47, %v1828_v37 }
 0x112   : > { %1353 = vst [vmem:[%s1835_s29 + $0x28] sm:$0xff] %v966_v46  ;;  %v968_v50 = vadd.f32 %v967_v48, %v1828_v37  ;;  %v519_v51 = vpop.f32.mrf.mxu0 }
 0x113   : > { %v969_v52 = vpop.f32.mrf.mxu1  ;;  %674 = vst [vmem:[%s1835_s29 + $0x10] sm:$0xff] %v518_v49  ;;  %v520_v53 = vadd.f32 %v519_v51, %v1830_v38 }
 0x114   : > { %1354 = vst [vmem:[%s1835_s29 + $0x30] sm:$0xff] %v968_v50  ;;  %v970_v54 = vadd.f32 %v969_v52, %v1830_v38  ;;  %v523_v55 = vpop.f32.mrf.mxu0 }
 0x115   : > { %v973_v56 = vpop.f32.mrf.mxu1  ;;  %675 = vst [vmem:[%s1835_s29 + $0x18] sm:$0xff] %v520_v53  ;;  %v524_v57 = vadd.f32 %v523_v55, %v1828_v37 }
 0x116   : > { %1355 = vst [vmem:[%s1835_s29 + $0x38] sm:$0xff] %v970_v54  ;;  %v974_v58 = vadd.f32 %v973_v56, %v1828_v37  ;;  %v525_v59 = vpop.f32.mrf.mxu0 }
 0x117   : > { %v975_v60 = vpop.f32.mrf.mxu1  ;;  %676 = vst [vmem:[%s1835_s29 + $0x40] sm:$0xff] %v524_v57  ;;  %v526_v61 = vadd.f32 %v525_v59, %v1830_v38 }
 0x118   : > { %1356 = vst [vmem:[%s1835_s29 + $0x60] sm:$0xff] %v974_v58  ;;  %v976_v62 = vadd.f32 %v975_v60, %v1830_v38  ;;  %v527_v63 = vpop.f32.mrf.mxu0 }
 0x119   : > { %v977_v0 = vpop.f32.mrf.mxu1  ;;  %677 = vst [vmem:[%s1835_s29 + $0x48] sm:$0xff] %v526_v61  ;;  %v528_v1 = vadd.f32 %v527_v63, %v1828_v37 }
 0x11a   : > { %1357 = vst [vmem:[%s1835_s29 + $0x68] sm:$0xff] %v976_v62  ;;  %v978_v2 = vadd.f32 %v977_v0, %v1828_v37  ;;  %v529_v3 = vpop.f32.mrf.mxu0 }
 0x11b   : > { %v979_v4 = vpop.f32.mrf.mxu1  ;;  %678 = vst [vmem:[%s1835_s29 + $0x50] sm:$0xff] %v528_v1  ;;  %v530_v5 = vadd.f32 %v529_v3, %v1830_v38 }
 0x11c   : > { %1358 = vst [vmem:[%s1835_s29 + $0x70] sm:$0xff] %v978_v2  ;;  %v980_v6 = vadd.f32 %v979_v4, %v1830_v38  ;;  %v533_v7 = vpop.f32.mrf.mxu0 }
 0x11d   : > { %v983_v8 = vpop.f32.mrf.mxu1  ;;  %679 = vst [vmem:[%s1835_s29 + $0x58] sm:$0xff] %v530_v5  ;;  %v534_v9 = vadd.f32 %v533_v7, %v1828_v37 }
 0x11e   : > { %1359 = vst [vmem:[%s1835_s29 + $0x78] sm:$0xff] %v980_v6  ;;  %v984_v10 = vadd.f32 %v983_v8, %v1828_v37  ;;  %v535_v11 = vpop.f32.mrf.mxu0 }
 0x11f   : > { %v985_v12 = vpop.f32.mrf.mxu1  ;;  %680 = vst [vmem:[%s1835_s29 + $0x80] sm:$0xff] %v534_v9  ;;  %v536_v13 = vadd.f32 %v535_v11, %v1830_v38 }
 0x120   : > { %1360 = vst [vmem:[%s1835_s29 + $0xa0] sm:$0xff] %v984_v10  ;;  %v986_v14 = vadd.f32 %v985_v12, %v1830_v38  ;;  %v537_v15 = vpop.f32.mrf.mxu0 }
 0x121   : > { %v987_v16 = vpop.f32.mrf.mxu1  ;;  %681 = vst [vmem:[%s1835_s29 + $0x88] sm:$0xff] %v536_v13  ;;  %v538_v17 = vadd.f32 %v537_v15, %v1828_v37 }
 0x122   : > { %1361 = vst [vmem:[%s1835_s29 + $0xa8] sm:$0xff] %v986_v14  ;;  %v988_v18 = vadd.f32 %v987_v16, %v1828_v37  ;;  %v539_v19 = vpop.f32.mrf.mxu0 }
 0x123   : > { %v989_v20 = vpop.f32.mrf.mxu1  ;;  %682 = vst [vmem:[%s1835_s29 + $0x90] sm:$0xff] %v538_v17  ;;  %v540_v21 = vadd.f32 %v539_v19, %v1830_v38 }
 0x124   : > { %1362 = vst [vmem:[%s1835_s29 + $0xb0] sm:$0xff] %v988_v18  ;;  %v990_v22 = vadd.f32 %v989_v20, %v1830_v38  ;;  %v543_v23 = vpop.f32.mrf.mxu0 }
 0x125   : > { %v993_v24 = vpop.f32.mrf.mxu1  ;;  %683 = vst [vmem:[%s1835_s29 + $0x98] sm:$0xff] %v540_v21  ;;  %v544_v25 = vadd.f32 %v543_v23, %v1828_v37 }
 0x126   : > { %1363 = vst [vmem:[%s1835_s29 + $0xb8] sm:$0xff] %v990_v22  ;;  %v994_v26 = vadd.f32 %v993_v24, %v1828_v37  ;;  %v545_v27 = vpop.f32.mrf.mxu0 }
 0x127   : > { %v995_v28 = vpop.f32.mrf.mxu1  ;;  %684 = vst [vmem:[%s1835_s29 + $0xc0] sm:$0xff] %v544_v25  ;;  %v546_v29 = vadd.f32 %v545_v27, %v1830_v38 }
 0x128   : > { %1364 = vst [vmem:[%s1835_s29 + $0xe0] sm:$0xff] %v994_v26  ;;  %v996_v30 = vadd.f32 %v995_v28, %v1830_v38  ;;  %v547_v31 = vpop.f32.mrf.mxu0 }
 0x129   : > { %v997_v32 = vpop.f32.mrf.mxu1  ;;  %685 = vst [vmem:[%s1835_s29 + $0xc8] sm:$0xff] %v546_v29  ;;  %v548_v33 = vadd.f32 %v547_v31, %v1828_v37 }
 0x12a   : > { %1365 = vst [vmem:[%s1835_s29 + $0xe8] sm:$0xff] %v996_v30  ;;  %v998_v34 = vadd.f32 %v997_v32, %v1828_v37  ;;  %v549_v35 = vpop.f32.mrf.mxu0 }
 0x12b   : > { %v999_v36 = vpop.f32.mrf.mxu1  ;;  %686 = vst [vmem:[%s1835_s29 + $0xd0] sm:$0xff] %v548_v33  ;;  %v550_v39 = vadd.f32 %v549_v35, %v1830_v38 }
 0x12c   : > { %1366 = vst [vmem:[%s1835_s29 + $0xf0] sm:$0xff] %v998_v34  ;;  %v1000_v40 = vadd.f32 %v999_v36, %v1830_v38  ;;  %v553_v41 = vpop.f32.mrf.mxu0 }
 0x12d   : > { %v1003_v42 = vpop.f32.mrf.mxu1  ;;  %687 = vst [vmem:[%s1835_s29 + $0xd8] sm:$0xff] %v550_v39  ;;  %v554_v43 = vadd.f32 %v553_v41, %v1828_v37 }
 0x12e   : > { %1367 = vst [vmem:[%s1835_s29 + $0xf8] sm:$0xff] %v1000_v40  ;;  %v1004_v44 = vadd.f32 %v1003_v42, %v1828_v37  ;;  %v555_v45 = vpop.f32.mrf.mxu0 }
 0x12f   : > { %v1005_v46 = vpop.f32.mrf.mxu1  ;;  %688 = vst [vmem:[%s1835_s29 + $0x100] sm:$0xff] %v554_v43  ;;  %v556_v47 = vadd.f32 %v555_v45, %v1830_v38 }
 0x130   : > { %1368 = vst [vmem:[%s1835_s29 + $0x120] sm:$0xff] %v1004_v44  ;;  %v1006_v48 = vadd.f32 %v1005_v46, %v1830_v38  ;;  %v557_v49 = vpop.f32.mrf.mxu0 }
 0x131   : > { %v1007_v50 = vpop.f32.mrf.mxu1  ;;  %689 = vst [vmem:[%s1835_s29 + $0x108] sm:$0xff] %v556_v47  ;;  %v558_v51 = vadd.f32 %v557_v49, %v1828_v37 }
 0x132   : > { %1369 = vst [vmem:[%s1835_s29 + $0x128] sm:$0xff] %v1006_v48  ;;  %v1008_v52 = vadd.f32 %v1007_v50, %v1828_v37  ;;  %v559_v53 = vpop.f32.mrf.mxu0 }
 0x133   : > { %v1009_v54 = vpop.f32.mrf.mxu1  ;;  %690 = vst [vmem:[%s1835_s29 + $0x110] sm:$0xff] %v558_v51  ;;  %v560_v55 = vadd.f32 %v559_v53, %v1830_v38 }
 0x134   : > { %1370 = vst [vmem:[%s1835_s29 + $0x130] sm:$0xff] %v1008_v52  ;;  %v1010_v56 = vadd.f32 %v1009_v54, %v1830_v38  ;;  %v563_v57 = vpop.f32.mrf.mxu0 }
 0x135   : > { %v1013_v58 = vpop.f32.mrf.mxu1  ;;  %691 = vst [vmem:[%s1835_s29 + $0x118] sm:$0xff] %v560_v55  ;;  %v564_v59 = vadd.f32 %v563_v57, %v1828_v37 }
 0x136   : > { %1371 = vst [vmem:[%s1835_s29 + $0x138] sm:$0xff] %v1010_v56  ;;  %v1014_v60 = vadd.f32 %v1013_v58, %v1828_v37  ;;  %v565_v61 = vpop.f32.mrf.mxu0 }
 0x137   : > { %v1015_v62 = vpop.f32.mrf.mxu1  ;;  %692 = vst [vmem:[%s1835_s29 + $0x140] sm:$0xff] %v564_v59  ;;  %v566_v63 = vadd.f32 %v565_v61, %v1830_v38 }
 0x138   : > { %1372 = vst [vmem:[%s1835_s29 + $0x160] sm:$0xff] %v1014_v60  ;;  %v1016_v0 = vadd.f32 %v1015_v62, %v1830_v38  ;;  %v567_v1 = vpop.f32.mrf.mxu0 }
 0x139   : > { %v1017_v2 = vpop.f32.mrf.mxu1  ;;  %693 = vst [vmem:[%s1835_s29 + $0x148] sm:$0xff] %v566_v63  ;;  %v568_v3 = vadd.f32 %v567_v1, %v1828_v37 }
 0x13a   : > { %1373 = vst [vmem:[%s1835_s29 + $0x168] sm:$0xff] %v1016_v0  ;;  %v1018_v4 = vadd.f32 %v1017_v2, %v1828_v37  ;;  %v569_v5 = vpop.f32.mrf.mxu0 }
 0x13b   : > { %v1019_v6 = vpop.f32.mrf.mxu1  ;;  %694 = vst [vmem:[%s1835_s29 + $0x150] sm:$0xff] %v568_v3  ;;  %v570_v7 = vadd.f32 %v569_v5, %v1830_v38 }
 0x13c   : > { %1374 = vst [vmem:[%s1835_s29 + $0x170] sm:$0xff] %v1018_v4  ;;  %v1020_v8 = vadd.f32 %v1019_v6, %v1830_v38  ;;  %v573_v9 = vpop.f32.mrf.mxu0 }
 0x13d   : > { %v1023_v10 = vpop.f32.mrf.mxu1  ;;  %695 = vst [vmem:[%s1835_s29 + $0x158] sm:$0xff] %v570_v7  ;;  %v574_v11 = vadd.f32 %v573_v9, %v1828_v37 }
 0x13e   : > { %1375 = vst [vmem:[%s1835_s29 + $0x178] sm:$0xff] %v1020_v8  ;;  %v1024_v12 = vadd.f32 %v1023_v10, %v1828_v37  ;;  %v575_v13 = vpop.f32.mrf.mxu0 }
 0x13f   : > { %v1025_v14 = vpop.f32.mrf.mxu1  ;;  %696 = vst [vmem:[%s1835_s29 + $0x180] sm:$0xff] %v574_v11  ;;  %v576_v15 = vadd.f32 %v575_v13, %v1830_v38 }
 0x140   : > { %1376 = vst [vmem:[%s1835_s29 + $0x1a0] sm:$0xff] %v1024_v12  ;;  %v1026_v16 = vadd.f32 %v1025_v14, %v1830_v38  ;;  %v577_v17 = vpop.f32.mrf.mxu0 }
 0x141   : > { %v1027_v18 = vpop.f32.mrf.mxu1  ;;  %697 = vst [vmem:[%s1835_s29 + $0x188] sm:$0xff] %v576_v15  ;;  %v578_v19 = vadd.f32 %v577_v17, %v1828_v37 }
 0x142   : > { %1377 = vst [vmem:[%s1835_s29 + $0x1a8] sm:$0xff] %v1026_v16  ;;  %v1028_v20 = vadd.f32 %v1027_v18, %v1828_v37  ;;  %v579_v21 = vpop.f32.mrf.mxu0 }
 0x143   : > { %v1029_v22 = vpop.f32.mrf.mxu1  ;;  %698 = vst [vmem:[%s1835_s29 + $0x190] sm:$0xff] %v578_v19  ;;  %v580_v23 = vadd.f32 %v579_v21, %v1830_v38 }
 0x144   : > { %1378 = vst [vmem:[%s1835_s29 + $0x1b0] sm:$0xff] %v1028_v20  ;;  %v1030_v24 = vadd.f32 %v1029_v22, %v1830_v38  ;;  %v583_v25 = vpop.f32.mrf.mxu0 }
 0x145   : > { %v1033_v26 = vpop.f32.mrf.mxu1  ;;  %699 = vst [vmem:[%s1835_s29 + $0x198] sm:$0xff] %v580_v23  ;;  %v584_v27 = vadd.f32 %v583_v25, %v1828_v37 }
 0x146   : > { %1379 = vst [vmem:[%s1835_s29 + $0x1b8] sm:$0xff] %v1030_v24  ;;  %v1034_v28 = vadd.f32 %v1033_v26, %v1828_v37  ;;  %v585_v29 = vpop.f32.mrf.mxu0 }
 0x147   : > { %v1035_v30 = vpop.f32.mrf.mxu1  ;;  %700 = vst [vmem:[%s1835_s29 + $0x1c0] sm:$0xff] %v584_v27  ;;  %v586_v31 = vadd.f32 %v585_v29, %v1830_v38 }
 0x148   : > { %1380 = vst [vmem:[%s1835_s29 + $0x1e0] sm:$0xff] %v1034_v28  ;;  %v1036_v32 = vadd.f32 %v1035_v30, %v1830_v38  ;;  %v587_v33 = vpop.f32.mrf.mxu0 }
 0x149   : > { %v1037_v34 = vpop.f32.mrf.mxu1  ;;  %701 = vst [vmem:[%s1835_s29 + $0x1c8] sm:$0xff] %v586_v31  ;;  %v588_v35 = vadd.f32 %v587_v33, %v1828_v37 }
 0x14a   : > { %1381 = vst [vmem:[%s1835_s29 + $0x1e8] sm:$0xff] %v1036_v32  ;;  %v1038_v36 = vadd.f32 %v1037_v34, %v1828_v37  ;;  %v589_v39 = vpop.f32.mrf.mxu0 }
 0x14b   : > { %v1039_v40 = vpop.f32.mrf.mxu1  ;;  %702 = vst [vmem:[%s1835_s29 + $0x1d0] sm:$0xff] %v588_v35  ;;  %v590_v41 = vadd.f32 %v589_v39, %v1830_v38 }
 0x14c   : > { %1382 = vst [vmem:[%s1835_s29 + $0x1f0] sm:$0xff] %v1038_v36  ;;  %v1040_v42 = vadd.f32 %v1039_v40, %v1830_v38  ;;  %v593_v43 = vpop.f32.mrf.mxu0 }
 0x14d   : > { %v1043_v44 = vpop.f32.mrf.mxu1  ;;  %703 = vst [vmem:[%s1835_s29 + $0x1d8] sm:$0xff] %v590_v41  ;;  %v594_v45 = vadd.f32 %v593_v43, %v1828_v37 }
 0x14e   : > { %1383 = vst [vmem:[%s1835_s29 + $0x1f8] sm:$0xff] %v1040_v42  ;;  %v1044_v46 = vadd.f32 %v1043_v44, %v1828_v37  ;;  %v595_v47 = vpop.f32.mrf.mxu0 }
 0x14f   : > { %v1045_v48 = vpop.f32.mrf.mxu1  ;;  %704 = vst [vmem:[%s1835_s29 + $0x200] sm:$0xff] %v594_v45  ;;  %v596_v49 = vadd.f32 %v595_v47, %v1830_v38 }
 0x150   : > { %1384 = vst [vmem:[%s1835_s29 + $0x220] sm:$0xff] %v1044_v46  ;;  %v1046_v50 = vadd.f32 %v1045_v48, %v1830_v38  ;;  %v597_v51 = vpop.f32.mrf.mxu0 }
 0x151   : > { %v1047_v52 = vpop.f32.mrf.mxu1  ;;  %705 = vst [vmem:[%s1835_s29 + $0x208] sm:$0xff] %v596_v49  ;;  %v598_v53 = vadd.f32 %v597_v51, %v1828_v37 }
 0x152   : > { %1385 = vst [vmem:[%s1835_s29 + $0x228] sm:$0xff] %v1046_v50  ;;  %v1048_v54 = vadd.f32 %v1047_v52, %v1828_v37  ;;  %v599_v55 = vpop.f32.mrf.mxu0 }
 0x153   : > { %v1049_v56 = vpop.f32.mrf.mxu1  ;;  %706 = vst [vmem:[%s1835_s29 + $0x210] sm:$0xff] %v598_v53  ;;  %v600_v57 = vadd.f32 %v599_v55, %v1830_v38 }
 0x154   : > { %1386 = vst [vmem:[%s1835_s29 + $0x230] sm:$0xff] %v1048_v54  ;;  %v1050_v58 = vadd.f32 %v1049_v56, %v1830_v38  ;;  %v603_v59 = vpop.f32.mrf.mxu0 }
 0x155   : > { %v1053_v60 = vpop.f32.mrf.mxu1  ;;  %707 = vst [vmem:[%s1835_s29 + $0x218] sm:$0xff] %v600_v57  ;;  %v604_v61 = vadd.f32 %v603_v59, %v1828_v37 }
 0x156   : > { %1387 = vst [vmem:[%s1835_s29 + $0x238] sm:$0xff] %v1050_v58  ;;  %v1054_v62 = vadd.f32 %v1053_v60, %v1828_v37  ;;  %v605_v63 = vpop.f32.mrf.mxu0 }
 0x157   : > { %v1055_v0 = vpop.f32.mrf.mxu1  ;;  %708 = vst [vmem:[%s1835_s29 + $0x240] sm:$0xff] %v604_v61  ;;  %v606_v1 = vadd.f32 %v605_v63, %v1830_v38 }
 0x158   : > { %1388 = vst [vmem:[%s1835_s29 + $0x260] sm:$0xff] %v1054_v62  ;;  %v1056_v2 = vadd.f32 %v1055_v0, %v1830_v38  ;;  %v607_v3 = vpop.f32.mrf.mxu0 }
 0x159   : > { %v1057_v4 = vpop.f32.mrf.mxu1  ;;  %709 = vst [vmem:[%s1835_s29 + $0x248] sm:$0xff] %v606_v1  ;;  %v608_v5 = vadd.f32 %v607_v3, %v1828_v37 }
 0x15a   : > { %1389 = vst [vmem:[%s1835_s29 + $0x268] sm:$0xff] %v1056_v2  ;;  %v1058_v6 = vadd.f32 %v1057_v4, %v1828_v37  ;;  %v609_v7 = vpop.f32.mrf.mxu0 }
 0x15b   : > { %v1059_v8 = vpop.f32.mrf.mxu1  ;;  %710 = vst [vmem:[%s1835_s29 + $0x250] sm:$0xff] %v608_v5  ;;  %v610_v9 = vadd.f32 %v609_v7, %v1830_v38 }
 0x15c   : > { %1390 = vst [vmem:[%s1835_s29 + $0x270] sm:$0xff] %v1058_v6  ;;  %v1060_v10 = vadd.f32 %v1059_v8, %v1830_v38  ;;  %v613_v11 = vpop.f32.mrf.mxu0 }
 0x15d   : > { %v1063_v12 = vpop.f32.mrf.mxu1  ;;  %711 = vst [vmem:[%s1835_s29 + $0x258] sm:$0xff] %v610_v9  ;;  %v614_v13 = vadd.f32 %v613_v11, %v1828_v37 }
 0x15e   : > { %1391 = vst [vmem:[%s1835_s29 + $0x278] sm:$0xff] %v1060_v10  ;;  %v1064_v14 = vadd.f32 %v1063_v12, %v1828_v37  ;;  %v615_v15 = vpop.f32.mrf.mxu0 }
 0x15f   : > { %v1065_v16 = vpop.f32.mrf.mxu1  ;;  %712 = vst [vmem:[%s1835_s29 + $0x280] sm:$0xff] %v614_v13  ;;  %v616_v17 = vadd.f32 %v615_v15, %v1830_v38 }
 0x160   : > { %1392 = vst [vmem:[%s1835_s29 + $0x2a0] sm:$0xff] %v1064_v14  ;;  %v1066_v18 = vadd.f32 %v1065_v16, %v1830_v38  ;;  %v617_v19 = vpop.f32.mrf.mxu0 }
 0x161   : > { %v1067_v20 = vpop.f32.mrf.mxu1  ;;  %713 = vst [vmem:[%s1835_s29 + $0x288] sm:$0xff] %v616_v17  ;;  %v618_v21 = vadd.f32 %v617_v19, %v1828_v37 }
 0x162   : > { %1393 = vst [vmem:[%s1835_s29 + $0x2a8] sm:$0xff] %v1066_v18  ;;  %v1068_v22 = vadd.f32 %v1067_v20, %v1828_v37  ;;  %v619_v23 = vpop.f32.mrf.mxu0 }
 0x163   : > { %v1069_v24 = vpop.f32.mrf.mxu1  ;;  %714 = vst [vmem:[%s1835_s29 + $0x290] sm:$0xff] %v618_v21  ;;  %v620_v25 = vadd.f32 %v619_v23, %v1830_v38 }
 0x164   : > { %1394 = vst [vmem:[%s1835_s29 + $0x2b0] sm:$0xff] %v1068_v22  ;;  %v1070_v26 = vadd.f32 %v1069_v24, %v1830_v38  ;;  %v623_v27 = vpop.f32.mrf.mxu0 }
 0x165   : > { %v1073_v28 = vpop.f32.mrf.mxu1  ;;  %715 = vst [vmem:[%s1835_s29 + $0x298] sm:$0xff] %v620_v25  ;;  %v624_v29 = vadd.f32 %v623_v27, %v1828_v37 }
 0x166   : > { %1395 = vst [vmem:[%s1835_s29 + $0x2b8] sm:$0xff] %v1070_v26  ;;  %v1074_v30 = vadd.f32 %v1073_v28, %v1828_v37  ;;  %v625_v31 = vpop.f32.mrf.mxu0 }
 0x167   : > { %v1075_v32 = vpop.f32.mrf.mxu1  ;;  %716 = vst [vmem:[%s1835_s29 + $0x2c0] sm:$0xff] %v624_v29  ;;  %v626_v33 = vadd.f32 %v625_v31, %v1830_v38 }
 0x168   : > { %1396 = vst [vmem:[%s1835_s29 + $0x2e0] sm:$0xff] %v1074_v30  ;;  %v1076_v34 = vadd.f32 %v1075_v32, %v1830_v38  ;;  %v627_v35 = vpop.f32.mrf.mxu0 }
 0x169   : > { %v1077_v36 = vpop.f32.mrf.mxu1  ;;  %717 = vst [vmem:[%s1835_s29 + $0x2c8] sm:$0xff] %v626_v33  ;;  %v628_v39 = vadd.f32 %v627_v35, %v1828_v37 }
 0x16a   : > { %1397 = vst [vmem:[%s1835_s29 + $0x2e8] sm:$0xff] %v1076_v34  ;;  %v1078_v40 = vadd.f32 %v1077_v36, %v1828_v37  ;;  %v629_v41 = vpop.f32.mrf.mxu0 }
 0x16b   : > { %v1079_v42 = vpop.f32.mrf.mxu1  ;;  %718 = vst [vmem:[%s1835_s29 + $0x2d0] sm:$0xff] %v628_v39  ;;  %v630_v43 = vadd.f32 %v629_v41, %v1830_v38 }
 0x16c   : > { %1398 = vst [vmem:[%s1835_s29 + $0x2f0] sm:$0xff] %v1078_v40  ;;  %v1080_v44 = vadd.f32 %v1079_v42, %v1830_v38  ;;  %v633_v45 = vpop.f32.mrf.mxu0 }
 0x16d   : > { %v1083_v46 = vpop.f32.mrf.mxu1  ;;  %719 = vst [vmem:[%s1835_s29 + $0x2d8] sm:$0xff] %v630_v43  ;;  %v634_v47 = vadd.f32 %v633_v45, %v1828_v37 }
 0x16e   : > { %1399 = vst [vmem:[%s1835_s29 + $0x2f8] sm:$0xff] %v1080_v44  ;;  %v1084_v48 = vadd.f32 %v1083_v46, %v1828_v37  ;;  %v635_v49 = vpop.f32.mrf.mxu0 }
 0x16f   : > { %v1085_v50 = vpop.f32.mrf.mxu1  ;;  %720 = vst [vmem:[%s1835_s29 + $0x300] sm:$0xff] %v634_v47  ;;  %v636_v51 = vadd.f32 %v635_v49, %v1830_v38 }
 0x170   : > { %1400 = vst [vmem:[%s1835_s29 + $0x320] sm:$0xff] %v1084_v48  ;;  %v1086_v52 = vadd.f32 %v1085_v50, %v1830_v38  ;;  %v637_v53 = vpop.f32.mrf.mxu0 }
 0x171   : > { %v1087_v54 = vpop.f32.mrf.mxu1  ;;  %721 = vst [vmem:[%s1835_s29 + $0x308] sm:$0xff] %v636_v51  ;;  %v638_v55 = vadd.f32 %v637_v53, %v1828_v37 }
 0x172   : > { %1401 = vst [vmem:[%s1835_s29 + $0x328] sm:$0xff] %v1086_v52  ;;  %v1088_v56 = vadd.f32 %v1087_v54, %v1828_v37  ;;  %v639_v57 = vpop.f32.mrf.mxu0 }
 0x173   : > { %v1089_v58 = vpop.f32.mrf.mxu1  ;;  %722 = vst [vmem:[%s1835_s29 + $0x310] sm:$0xff] %v638_v55  ;;  %v640_v59 = vadd.f32 %v639_v57, %v1830_v38 }
 0x174   : > { %1402 = vst [vmem:[%s1835_s29 + $0x330] sm:$0xff] %v1088_v56  ;;  %v1090_v60 = vadd.f32 %v1089_v58, %v1830_v38  ;;  %v643_v61 = vpop.f32.mrf.mxu0 }
 0x175   : > { %v1093_v62 = vpop.f32.mrf.mxu1  ;;  %723 = vst [vmem:[%s1835_s29 + $0x318] sm:$0xff] %v640_v59  ;;  %v644_v63 = vadd.f32 %v643_v61, %v1828_v37 }
 0x176   : > { %1403 = vst [vmem:[%s1835_s29 + $0x338] sm:$0xff] %v1090_v60  ;;  %v1094_v0 = vadd.f32 %v1093_v62, %v1828_v37  ;;  %v645_v1 = vpop.f32.mrf.mxu0 }
 0x177   : > { %v1095_v2 = vpop.f32.mrf.mxu1  ;;  %724 = vst [vmem:[%s1835_s29 + $0x340] sm:$0xff] %v644_v63  ;;  %v646_v3 = vadd.f32 %v645_v1, %v1830_v38 }
 0x178   : > { %1404 = vst [vmem:[%s1835_s29 + $0x360] sm:$0xff] %v1094_v0  ;;  %v1096_v4 = vadd.f32 %v1095_v2, %v1830_v38  ;;  %v647_v5 = vpop.f32.mrf.mxu0 }
 0x179   : > { %v1097_v6 = vpop.f32.mrf.mxu1  ;;  %725 = vst [vmem:[%s1835_s29 + $0x348] sm:$0xff] %v646_v3  ;;  %v648_v7 = vadd.f32 %v647_v5, %v1828_v37 }
 0x17a   : > { %1405 = vst [vmem:[%s1835_s29 + $0x368] sm:$0xff] %v1096_v4  ;;  %v1098_v8 = vadd.f32 %v1097_v6, %v1828_v37  ;;  %v649_v9 = vpop.f32.mrf.mxu0 }
 0x17b   : > { %v1099_v10 = vpop.f32.mrf.mxu1  ;;  %726 = vst [vmem:[%s1835_s29 + $0x350] sm:$0xff] %v648_v7  ;;  %v650_v11 = vadd.f32 %v649_v9, %v1830_v38 }
 0x17c   : > { %1406 = vst [vmem:[%s1835_s29 + $0x370] sm:$0xff] %v1098_v8  ;;  %v1100_v12 = vadd.f32 %v1099_v10, %v1830_v38  ;;  %v653_v13 = vpop.f32.mrf.mxu0 }
 0x17d   : > { %v1103_v14 = vpop.f32.mrf.mxu1  ;;  %727 = vst [vmem:[%s1835_s29 + $0x358] sm:$0xff] %v650_v11  ;;  %v654_v15 = vadd.f32 %v653_v13, %v1828_v37 }
 0x17e   : > { %1407 = vst [vmem:[%s1835_s29 + $0x378] sm:$0xff] %v1100_v12  ;;  %v1104_v16 = vadd.f32 %v1103_v14, %v1828_v37  ;;  %v655_v17 = vpop.f32.mrf.mxu0 }
 0x17f   : > { %v1105_v18 = vpop.f32.mrf.mxu1  ;;  %728 = vst [vmem:[%s1835_s29 + $0x380] sm:$0xff] %v654_v15  ;;  %v656_v19 = vadd.f32 %v655_v17, %v1830_v38 }
 0x180   : > { %1408 = vst [vmem:[%s1835_s29 + $0x3a0] sm:$0xff] %v1104_v16  ;;  %v1106_v20 = vadd.f32 %v1105_v18, %v1830_v38  ;;  %v657_v21 = vpop.f32.mrf.mxu0 }
 0x181   : > { %v1107_v22 = vpop.f32.mrf.mxu1  ;;  %729 = vst [vmem:[%s1835_s29 + $0x388] sm:$0xff] %v656_v19  ;;  %v658_v23 = vadd.f32 %v657_v21, %v1828_v37 }
 0x182   : > { %1409 = vst [vmem:[%s1835_s29 + $0x3a8] sm:$0xff] %v1106_v20  ;;  %v1108_v24 = vadd.f32 %v1107_v22, %v1828_v37  ;;  %v659_v25 = vpop.f32.mrf.mxu0 }
 0x183   : > { %v1109_v26 = vpop.f32.mrf.mxu1  ;;  %730 = vst [vmem:[%s1835_s29 + $0x390] sm:$0xff] %v658_v23  ;;  %v660_v27 = vadd.f32 %v659_v25, %v1830_v38 }
 0x184   : > { %1410 = vst [vmem:[%s1835_s29 + $0x3b0] sm:$0xff] %v1108_v24  ;;  %v1110_v28 = vadd.f32 %v1109_v26, %v1830_v38  ;;  %v663_v29 = vpop.f32.mrf.mxu0 }
 0x185   : > { %v1113_v30 = vpop.f32.mrf.mxu1  ;;  %731 = vst [vmem:[%s1835_s29 + $0x398] sm:$0xff] %v660_v27  ;;  %v664_v31 = vadd.f32 %v663_v29, %v1828_v37 }
 0x186   : > { %1411 = vst [vmem:[%s1835_s29 + $0x3b8] sm:$0xff] %v1110_v28  ;;  %v1114_v32 = vadd.f32 %v1113_v30, %v1828_v37  ;;  %v665_v33 = vpop.f32.mrf.mxu0 }
 0x187   : > { %v1115_v34 = vpop.f32.mrf.mxu1  ;;  %732 = vst [vmem:[%s1835_s29 + $0x3c0] sm:$0xff] %v664_v31  ;;  %v666_v35 = vadd.f32 %v665_v33, %v1830_v38 }
 0x188   : > { %1412 = vst [vmem:[%s1835_s29 + $0x3e0] sm:$0xff] %v1114_v32  ;;  %v1116_v36 = vadd.f32 %v1115_v34, %v1830_v38  ;;  %v667_v39 = vpop.f32.mrf.mxu0 }
 0x189   : > { %v1117_v40 = vpop.f32.mrf.mxu1  ;;  %733 = vst [vmem:[%s1835_s29 + $0x3c8] sm:$0xff] %v666_v35  ;;  %v668_v41 = vadd.f32 %v667_v39, %v1828_v37 }
 0x18a   : > { %1413 = vst [vmem:[%s1835_s29 + $0x3e8] sm:$0xff] %v1116_v36  ;;  %v1118_v42 = vadd.f32 %v1117_v40, %v1828_v37  ;;  %v669_v43 = vpop.f32.mrf.mxu0 }
 0x18b   : > { %v1119_v44 = vpop.f32.mrf.mxu1  ;;  %734 = vst [vmem:[%s1835_s29 + $0x3d0] sm:$0xff] %v668_v41  ;;  %v670_v45 = vadd.f32 %v669_v43, %v1830_v38 }
 0x18c   : > { %1414 = vst [vmem:[%s1835_s29 + $0x3f0] sm:$0xff] %v1118_v42  ;;  %v1120_v46 = vadd.f32 %v1119_v44, %v1830_v38 }
 0x18d   : > { %735 = vst [vmem:[%s1835_s29 + $0x3d8] sm:$0xff] %v670_v45 }
 0x18e   : > { %1415 = vst [vmem:[%s1835_s29 + $0x3f8] sm:$0xff] %v1120_v46 }
 0x18f PF: > { %s13_s12 = sadd.s32 1, %s1530_s12  }
 0x190   : > { %p10_p5 = scmp.ge.s32.totalorder %s13_s12, 4  }
 0x192   :  { %12 = sbr.rel (!%p10_p5) target bundleno = 1 (0x1), region = 64 }

</bundles_post_ra>
